<compile_context>
chip_gen: v7x
topology: tpu7x:2x2x1
jax: 0.10.0
libtpu: 0.0.40
codegen_flags: <defaults>
</compile_context>

<pallas_src>
import functools

import jax
import jax.numpy as jnp
from jax.experimental import pallas as pl
from jax.experimental.pallas import tpu as pltpu


# ----------------------------------------------------------------------------
# Kernel
# ----------------------------------------------------------------------------
def _pointwise_conv_kernel(qa_ref, pa_ref, xw1_ref, b1_ref, w2_ref, b2_ref,
                           out_ref, *, k):
    qa = qa_ref[0]      # (TILE_M, 8) f32 : [-2*pos, |pos|^2, 1, 0, 0, 0]
    pa = pa_ref[0]      # (8, N)      f32 : [pos; 1; |pos|^2; 0] (coordinate-major)
    xw1 = xw1_ref[0]    # (N, F)      bf16: concat([x, pos]) @ (w1 * bn1_scale / k)

    tm = qa.shape[0]
    n = pa.shape[1]

    # --- squared distances: one f32 MXU matmul, no VPU coordinate loop -------
    # d2[i,j] = |q_i|^2 + |p_j|^2 - 2 q_i.p_j   (exact expansion via aug coords)
    d2 = jnp.dot(qa, pa, preferred_element_type=jnp.float32)        # (TILE_M, N)

    # --- top-k nearest (smallest d2), first-occurrence tie-break --------------
    # (1, N) iota broadcast across sublanes; wg accumulated directly in bf16
    # (values are exactly 0/1 since selected lanes are poisoned).
    iota_row = jax.lax.broadcasted_iota(jnp.int32, (1, n), 1)
    big = jnp.float32(1e30)

    def select_one(_, carry):
        d2_c, wg_c = carry
        dmin = jnp.min(d2_c, axis=-1, keepdims=True)                       # (TILE_M, 1)
        idx = jnp.min(jnp.where(d2_c == dmin, iota_row, n),
                      axis=-1, keepdims=True)                              # first occurrence
        onehot = iota_row == idx                                           # (TILE_M, N) bool
        wg_c = wg_c + onehot.astype(jnp.bfloat16)
        d2_c = jnp.where(onehot, big, d2_c)                                # poison selected only
        return d2_c, wg_c

    _, wg = jax.lax.fori_loop(
        0, k, select_one, (d2, jnp.zeros((tm, n), jnp.bfloat16)))

    # --- fused gather + conv1(+BN1, /k folded) then ReLU, conv2(+BN2) ---------
    h = jnp.dot(wg, xw1, preferred_element_type=jnp.float32) + b1_ref[...]  # (TILE_M, F)
    h = jnp.maximum(h, 0.0)                                                 # ReLU
    o = jnp.dot(h.astype(jnp.bfloat16), w2_ref[...],
                preferred_element_type=jnp.float32) + b2_ref[...]           # conv2 + BN2 (no final act)
    out_ref[0] = o


# ----------------------------------------------------------------------------
# Wrapper helpers
# ----------------------------------------------------------------------------
def _round_up(v, m):
    return ((v + m - 1) // m) * m


def _pick_tile(n, target):
    """Largest tile <= target dividing n, multiple of 8, VMEM-aware."""
    # (TILE_M, N) selection temporaries cost ~12 B/elem; keep them under ~16 MiB
    # so they fit comfortably even inside v7x's 64 MiB VMEM.
    budget_rows = max(8, (16 << 20) // (12 * max(n, 1)))
    target = max(8, min(target, budget_rows))
    if n <= target:
        return n
    t0 = target - (target % 8)
    for t in range(t0, 7, -8):
        if n % t == 0:
            return t
    # TODO(synk): awkward N with no multiple-of-8 divisor <= target falls back to
    # tile_m=8 (when N % 8 == 0) or a single full-N tile (VMEM-heavy for large N).
    return 8 if n % 8 == 0 else n


def _vmem_limit_bytes(tile_m, n, f_pad):
    """Size the VMEM request from the working set; never request full physical VMEM."""
    work = (2 * tile_m * 8 * 4          # aug_q block (double-buffered)
            + 2 * 8 * n * 4             # aug_p (batch-resident, double-buffered)
            + 2 * n * f_pad * 2         # xw1 (bf16, batch-resident)
            + 2 * f_pad * f_pad * 2     # w2 (bf16)
            + 4 * f_pad * 4             # b1 / b2
            + 2 * tile_m * f_pad * 4    # output block
            + 12 * tile_m * n)          # d2 / wg / selection temporaries
    limit = work + (8 << 20)            # headroom for Mosaic internal scratch / DMA
    try:
        cap = int(0.85 * pltpu.get_tpu_info().vmem_capacity_bytes)
    except Exception:
        cap = 56 << 20                  # safe on v7x (64 MiB physical per TC)
    return int(max(32 << 20, min(limit, cap)))


def _fold_and_pad_params(params, k, f_pad, eps=1e-5):
    """Fold eval-mode BN + 1/k mean into the conv weights; pad to TPU-friendly shapes."""
    s1 = params["g1"] / jnp.sqrt(params["var1"] + eps)
    w1 = (params["w1"] * s1[None, :]) / float(k)                 # 1/k mean folded here
    b1 = (params["b1"] - params["mean1"]) * s1 + params["be1"]
    s2 = params["g2"] / jnp.sqrt(params["var2"] + eps)
    w2 = params["w2"] * s2[None, :]
    b2 = (params["b2"] - params["mean2"]) * s2 + params["be2"]

    in_dim, h = w1.shape
    # w1 stays f32: the folded conv1 matmul runs in the wrapper (outside the kernel).
    w1p = jnp.zeros((in_dim, f_pad), jnp.float32).at[:, :h].set(w1)
    b1p = jnp.zeros((1, f_pad), jnp.float32).at[0, :h].set(b1)
    w2p = jnp.zeros((f_pad, f_pad), jnp.float32).at[:h, :h].set(w2).astype(jnp.bfloat16)
    b2p = jnp.zeros((1, f_pad), jnp.float32).at[0, :h].set(b2)
    return w1p, b1p, w2p, b2p


# ----------------------------------------------------------------------------
# Wrapper
# ----------------------------------------------------------------------------
def pointwise_conv_forward(x, pos, params, k, *, tile_m_target=256):
    """x: (B, N, C) features, pos: (B, N, 3) coordinates.  Returns (B, N, out_feat_dim)."""
    B, N, C = x.shape
    out_dim = params["w2"].shape[-1]
    in_dim = C + 3
    assert params["w1"].shape[0] == in_dim
    assert k <= N

    f_pad = _round_up(out_dim, 128)     # lane-dense hidden/output channels

    w1p, b1p, w2p, b2p = _fold_and_pad_params(params, k, f_pad)

    x = x.astype(jnp.float32)
    pos = pos.astype(jnp.float32)

    # conv1 (+BN1, /k) folded into the gather operand: one bf16 (B, N, f_pad) slab.
    xw1 = (jnp.concatenate([x, pos], axis=-1) @ w1p).astype(jnp.bfloat16)

    # Augmented coordinates (coord dim padded 3 -> 8) so the in-kernel distance
    # computation is a single f32 MXU matmul:  d2 = |q|^2 + |p|^2 - 2 q.p
    pn = jnp.sum(pos * pos, axis=-1, keepdims=True)                 # (B, N, 1)
    ones = jnp.ones_like(pn)
    zpad = jnp.zeros((B, N, 3), jnp.float32)
    aug_q = jnp.concatenate([-2.0 * pos, pn, ones, zpad], axis=-1)  # (B, N, 8)
    aug_p = jnp.transpose(
        jnp.concatenate([pos, ones, pn, zpad], axis=-1), (0, 2, 1))  # (B, 8, N)

    tile_m = _pick_tile(N, tile_m_target)
    n_tiles = N // tile_m

    kernel = functools.partial(_pointwise_conv_kernel, k=k)

    y = pl.pallas_call(
        kernel,
        out_shape=jax.ShapeDtypeStruct((B, N, f_pad), jnp.float32),
        grid=(B, n_tiles),
        in_specs=[
            # query aug-coordinates: tiled along the query axis
            pl.BlockSpec((1, tile_m, 8), lambda b, m: (b, m, 0)),
            # full point cloud (coord-major) / folded features: tile-invariant,
            # stay VMEM-resident per batch
            pl.BlockSpec((1, 8, N), lambda b, m: (b, 0, 0)),
            pl.BlockSpec((1, N, f_pad), lambda b, m: (b, 0, 0)),
            # folded MLP params: replicated
            pl.BlockSpec((1, f_pad), lambda b, m: (0, 0)),
            pl.BlockSpec((f_pad, f_pad), lambda b, m: (0, 0)),
            pl.BlockSpec((1, f_pad), lambda b, m: (0, 0)),
        ],
        out_specs=pl.BlockSpec((1, tile_m, f_pad), lambda b, m: (b, m, 0)),
        compiler_params=pltpu.CompilerParams(
            dimension_semantics=("parallel", "parallel"),   # megacore sharding on v7x
            vmem_limit_bytes=_vmem_limit_bytes(tile_m, N, f_pad),
        ),
    )(aug_q, aug_p, xw1, b1p, w2p, b2p)

    return y[:, :, :out_dim]


# ----------------------------------------------------------------------------
# Params + pure-JAX reference (mirrors the PyTorch forward, default path)
# ----------------------------------------------------------------------------
def init_params(key, in_dim, out_dim):
    ks = jax.random.split(key, 12)
    return {
        "w1": 0.1 * jax.random.normal(ks[0], (in_dim, out_dim), jnp.float32),
        "b1": 0.1 * jax.random.normal(ks[1], (out_dim,), jnp.float32),
        "g1": 1.0 + 0.1 * jax.random.normal(ks[2], (out_dim,), jnp.float32),
        "be1": 0.1 * jax.random.normal(ks[3], (out_dim,), jnp.float32),
        "mean1": 0.1 * jax.random.normal(ks[4], (out_dim,), jnp.float32),
        "var1": 1.0 + 0.1 * jnp.abs(jax.random.normal(ks[5], (out_dim,), jnp.float32)),
        "w2": 0.1 * jax.random.normal(ks[6], (out_dim, out_dim), jnp.float32),
        "b2": 0.1 * jax.random.normal(ks[7], (out_dim,), jnp.float32),
        "g2": 1.0 + 0.1 * jax.random.normal(ks[8], (out_dim,), jnp.float32),
        "be2": 0.1 * jax.random.normal(ks[9], (out_dim,), jnp.float32),
        "mean2": 0.1 * jax.random.normal(ks[10], (out_dim,), jnp.float32),
        "var2": 1.0 + 0.1 * jnp.abs(jax.random.normal(ks[11], (out_dim,), jnp.float32)),
    }


def reference(x, pos, params, k, eps=1e-5):
    d2 = jnp.sum((pos[:, :, None, :] - pos[:, None, :, :]) ** 2, axis=-1)   # (B, N, N)
    _, idx = jax.lax.top_k(-d2, k)                                          # k nearest
    gx = jax.vmap(lambda f, i: f[i])(x, idx)                                # (B, N, k, C)
    gp = jax.vmap(lambda f, i: f[i])(pos, idx)                              # (B, N, k, 3)
    feat = jnp.concatenate([gx, gp], axis=-1)
    avg = jnp.mean(feat, axis=2)                                            # (B, N, C+3)
    h = avg @ params["w1"] + params["b1"]
    h = (h - params["mean1"]) / jnp.sqrt(params["var1"] + eps) * params["g1"] + params["be1"]
    h = jnp.maximum(h, 0.0)
    o = h @ params["w2"] + params["b2"]
    o = (o - params["mean2"]) / jnp.sqrt(params["var2"] + eps) * params["g2"] + params["be2"]
    return o


# ----------------------------------------------------------------------------
# Demo / self-test
# ----------------------------------------------------------------------------
if __name__ == "__main__":
    B, N, C = 2, 16, 4           # batch, points, feature channels
    OUT = 32                     # out_feat_dim
    K = 8                        # neighbors (module default is 16; K <= N here)

    key = jax.random.PRNGKey(0)
    kx, kp, kpar = jax.random.split(key, 3)
    x = jax.random.normal(kx, (B, N, C), jnp.float32)
    pos = jax.random.normal(kp, (B, N, 3), jnp.float32)
    params = init_params(kpar, C + 3, OUT)

    y = pointwise_conv_forward(x, pos, params, k=K)
    y = jax.block_until_ready(y)

    y_ref = reference(x, pos, params, k=K)
    assert y.shape == (B, N, OUT)
    assert jnp.allclose(y, y_ref, rtol=2e-2, atol=5e-3), (
        "mismatch vs reference, max abs err = %g" % float(jnp.max(jnp.abs(y - y_ref))))
    print("KERNEL_OK")
</pallas_src>

<mosaic_0001>
module attributes {stable_mosaic.version = 11 : i64} {
  func.func @_pointwise_conv_kernel(%arg0: i32, %arg1: i32, %arg2: memref<1x16x8xf32, #tpu.memory_space<vmem>>, %arg3: memref<1x8x16xf32, #tpu.memory_space<vmem>>, %arg4: memref<1x16x128xbf16, #tpu.memory_space<vmem>>, %arg5: memref<1x128xf32, #tpu.memory_space<vmem>>, %arg6: memref<128x128xbf16, #tpu.memory_space<vmem>>, %arg7: memref<1x128xf32, #tpu.memory_space<vmem>>, %arg8: memref<1x16x128xf32, #tpu.memory_space<vmem>>) attributes {dimension_semantics = [#tpu.dimension_semantics<parallel>, #tpu.dimension_semantics<parallel>], iteration_bounds = array<i64: 2, 1>, scalar_prefetch = 0 : i64, scratch_operands = 0 : i64, tpu.core_type = #tpu.core_type<tc>, window_params = [{transform_indices = @transform_0, window_bounds = array<i64: 1, 16, 8>}, {transform_indices = @transform_1, window_bounds = array<i64: 1, 8, 16>}, {transform_indices = @transform_2, window_bounds = array<i64: 1, 16, 128>}, {pipeline_mode = #tpu.pipeline_mode<synchronous>, transform_indices = @transform_3, window_bounds = array<i64: 1, 128>}, {pipeline_mode = #tpu.pipeline_mode<synchronous>, transform_indices = @transform_4, window_bounds = array<i64: 128, 128>}, {pipeline_mode = #tpu.pipeline_mode<synchronous>, transform_indices = @transform_5, window_bounds = array<i64: 1, 128>}, {transform_indices = @transform_6, window_bounds = array<i64: 1, 16, 128>}]} {
    %c0 = arith.constant 0 : index
    %c0_0 = arith.constant 0 : index
    %c0_1 = arith.constant 0 : index
    %0 = vector.load %arg2[%c0, %c0_0, %c0_1] : memref<1x16x8xf32, #tpu.memory_space<vmem>>, vector<1x16x8xf32>
    %1 = vector.shape_cast %0 : vector<1x16x8xf32> to vector<16x8xf32>
    %c0_2 = arith.constant 0 : index
    %c0_3 = arith.constant 0 : index
    %c0_4 = arith.constant 0 : index
    %2 = vector.load %arg3[%c0_2, %c0_3, %c0_4] : memref<1x8x16xf32, #tpu.memory_space<vmem>>, vector<1x8x16xf32>
    %3 = vector.shape_cast %2 : vector<1x8x16xf32> to vector<8x16xf32>
    %c0_5 = arith.constant 0 : index
    %c0_6 = arith.constant 0 : index
    %c0_7 = arith.constant 0 : index
    %4 = vector.load %arg4[%c0_5, %c0_6, %c0_7] : memref<1x16x128xbf16, #tpu.memory_space<vmem>>, vector<1x16x128xbf16>
    %5 = vector.shape_cast %4 : vector<1x16x128xbf16> to vector<16x128xbf16>
    %cst = arith.constant dense<0.000000e+00> : vector<16x16xf32>
    %6 = tpu.matmul %1, %3, %cst {dimension_numbers = #tpu.dot_dimension_numbers<[1], [0], [0], [1], [0, 0, 1, 1], [], []>} : vector<16x8xf32>, vector<8x16xf32>, vector<16x16xf32> -> vector<16x16xf32>
    %7 = tpu.iota {dimensions = array<i32: 1>} : vector<1x16xi32>
    %cst_8 = arith.constant 0.000000e+00 : bf16
    %8 = vector.broadcast %cst_8 : bf16 to vector<16x16xbf16>
    %cst_9 = arith.constant 1.000000e+30 : f32
    %c0_i32 = arith.constant 0 : i32
    %c8_i32 = arith.constant 8 : i32
    %9 = arith.addi %c0_i32, %c8_i32 : i32
    %c1_i32 = arith.constant 1 : i32
    %10:2 = scf.for %arg9 = %c0_i32 to %9 step %c1_i32 iter_args(%arg10 = %6, %arg11 = %8) -> (vector<16x16xf32>, vector<16x16xbf16>)  : i32 {
      %cst_22 = arith.constant dense<0x7F800000> : vector<16xf32>
      %26 = vector.multi_reduction <minimumf>, %arg10, %cst_22 [1] : vector<16x16xf32> to vector<16xf32>
      %27 = vector.shape_cast %26 : vector<16xf32> to vector<16x1xf32>
      %28 = vector.broadcast %27 : vector<16x1xf32> to vector<16x16xf32>
      %29 = arith.cmpf oeq, %arg10, %28 : vector<16x16xf32>
      %c16_i32 = arith.constant 16 : i32
      %30 = vector.shape_cast %7 : vector<1x16xi32> to vector<1x16xi32>
      %31 = vector.broadcast %30 : vector<1x16xi32> to vector<16x16xi32>
      %32 = vector.broadcast %c16_i32 : i32 to vector<16x16xi32>
      %33 = arith.select %29, %31, %32 : vector<16x16xi1>, vector<16x16xi32>
      %cst_23 = arith.constant dense<2147483647> : vector<16xi32>
      %34 = vector.multi_reduction <minsi>, %33, %cst_23 [1] : vector<16x16xi32> to vector<16xi32>
      %35 = vector.shape_cast %34 : vector<16xi32> to vector<16x1xi32>
      %36 = vector.broadcast %7 : vector<1x16xi32> to vector<16x16xi32>
      %37 = vector.broadcast %35 : vector<16x1xi32> to vector<16x16xi32>
      %38 = arith.cmpi eq, %36, %37 : vector<16x16xi32>
      %39 = arith.extui %38 : vector<16x16xi1> to vector<16x16xi32>
      %40 = arith.sitofp %39 : vector<16x16xi32> to vector<16x16xf32>
      %41 = arith.truncf %40 : vector<16x16xf32> to vector<16x16xbf16>
      %42 = arith.addf %arg11, %41 : vector<16x16xbf16>
      %43 = vector.broadcast %cst_9 : f32 to vector<16x16xf32>
      %44 = arith.select %38, %43, %arg10 : vector<16x16xi1>, vector<16x16xf32>
      scf.yield %44, %42 : vector<16x16xf32>, vector<16x16xbf16>
    }
    %cst_10 = arith.constant dense<0.000000e+00> : vector<16x128xf32>
    %11 = tpu.matmul %10#1, %5, %cst_10 {dimension_numbers = #tpu.dot_dimension_numbers<[1], [0], [0], [1], [0, 0, 1, 1], [], []>} : vector<16x16xbf16>, vector<16x128xbf16>, vector<16x128xf32> -> vector<16x128xf32>
    %c0_11 = arith.constant 0 : index
    %c0_12 = arith.constant 0 : index
    %12 = vector.load %arg5[%c0_11, %c0_12] : memref<1x128xf32, #tpu.memory_space<vmem>>, vector<1x128xf32>
    %13 = vector.broadcast %12 : vector<1x128xf32> to vector<16x128xf32>
    %14 = arith.addf %11, %13 : vector<16x128xf32>
    %cst_13 = arith.constant 0.000000e+00 : f32
    %15 = vector.broadcast %cst_13 : f32 to vector<16x128xf32>
    %16 = arith.maximumf %14, %15 : vector<16x128xf32>
    %17 = arith.truncf %16 : vector<16x128xf32> to vector<16x128xbf16>
    %c0_14 = arith.constant 0 : index
    %c0_15 = arith.constant 0 : index
    %18 = vector.load %arg6[%c0_14, %c0_15] : memref<128x128xbf16, #tpu.memory_space<vmem>>, vector<128x128xbf16>
    %cst_16 = arith.constant dense<0.000000e+00> : vector<16x128xf32>
    %19 = tpu.matmul %17, %18, %cst_16 {dimension_numbers = #tpu.dot_dimension_numbers<[1], [0], [0], [1], [0, 0, 1, 1], [], []>} : vector<16x128xbf16>, vector<128x128xbf16>, vector<16x128xf32> -> vector<16x128xf32>
    %c0_17 = arith.constant 0 : index
    %c0_18 = arith.constant 0 : index
    %20 = vector.load %arg7[%c0_17, %c0_18] : memref<1x128xf32, #tpu.memory_space<vmem>>, vector<1x128xf32>
    %21 = vector.broadcast %20 : vector<1x128xf32> to vector<16x128xf32>
    %22 = arith.addf %19, %21 : vector<16x128xf32>
    %c0_19 = arith.constant 0 : index
    %c0_20 = arith.constant 0 : index
    %c0_21 = arith.constant 0 : index
    %23 = vector.load %arg8[%c0_19, %c0_20, %c0_21] : memref<1x16x128xf32, #tpu.memory_space<vmem>>, vector<1x16x128xf32>
    %24 = vector.shape_cast %23 : vector<1x16x128xf32> to vector<16x128xf32>
    %25 = vector.shape_cast %22 : vector<16x128xf32> to vector<1x16x128xf32>
    tpu.vector_store %arg8[%c0_19, %c0_20, %c0_21], %25 {strides = array<i32>} : memref<1x16x128xf32, #tpu.memory_space<vmem>>, vector<1x16x128xf32>,
    return
  }
  func.func @transform_0(%arg0: i32, %arg1: i32) -> (i32, i32, i32) {
    %c0_i32 = arith.constant 0 : i32
    %c0_i32_0 = arith.constant 0 : i32
    return %arg0, %arg1, %c0_i32 : i32, i32, i32
  }
  func.func @transform_1(%arg0: i32, %arg1: i32) -> (i32, i32, i32) {
    %c0_i32 = arith.constant 0 : i32
    %c0_i32_0 = arith.constant 0 : i32
    %c0_i32_1 = arith.constant 0 : i32
    return %arg0, %c0_i32, %c0_i32_0 : i32, i32, i32
  }
  func.func @transform_2(%arg0: i32, %arg1: i32) -> (i32, i32, i32) {
    %c0_i32 = arith.constant 0 : i32
    %c0_i32_0 = arith.constant 0 : i32
    %c0_i32_1 = arith.constant 0 : i32
    return %arg0, %c0_i32, %c0_i32_0 : i32, i32, i32
  }
  func.func @transform_3(%arg0: i32, %arg1: i32) -> (i32, i32) {
    %c0_i32 = arith.constant 0 : i32
    %c0_i32_0 = arith.constant 0 : i32
    %c0_i32_1 = arith.constant 0 : i32
    return %c0_i32, %c0_i32_0 : i32, i32
  }
  func.func @transform_4(%arg0: i32, %arg1: i32) -> (i32, i32) {
    %c0_i32 = arith.constant 0 : i32
    %c0_i32_0 = arith.constant 0 : i32
    %c0_i32_1 = arith.constant 0 : i32
    return %c0_i32, %c0_i32_0 : i32, i32
  }
  func.func @transform_5(%arg0: i32, %arg1: i32) -> (i32, i32) {
    %c0_i32 = arith.constant 0 : i32
    %c0_i32_0 = arith.constant 0 : i32
    %c0_i32_1 = arith.constant 0 : i32
    return %c0_i32, %c0_i32_0 : i32, i32
  }
  func.func @transform_6(%arg0: i32, %arg1: i32) -> (i32, i32, i32) {
    %c0_i32 = arith.constant 0 : i32
    %c0_i32_0 = arith.constant 0 : i32
    return %arg0, %arg1, %c0_i32 : i32, i32, i32
  }
}

</mosaic_0001>

<bundles_post_ra>
// kernel: tpu_custom_call.1
= control target key start
LH: loop header
LB: loop body
LE: loop exit
PB: predicated region body
PF: predicated region fallthrough
CT: control target
= control target key end

     0   :  { %11 = vsyncpa [#allocation3], 0  ;;  %s1400_s0 = inlined_call_operand.vmem [shape: f32[2,16,8], index: 0, kind: input, shape index: {}]   ;;  %s1401_s1 = inlined_call_operand.vmem [shape: f32[2,8,16], index: 1, kind: input, shape index: {}]   ;;  %s1402_s2 = inlined_call_operand.vmem [shape: bf16[2,16,128], index: 2, kind: input, shape index: {}]   ;;  %s1403_s3 = inlined_call_operand.vmem [shape: f32[1,128], index: 3, kind: input, shape index: {}]   ;;  %s1404_s4 = inlined_call_operand.hbm [shape: bf16[128,128], index: 4, kind: input, shape index: {}]   ;;  %s1405_s5 = inlined_call_operand.vmem [shape: f32[1,128], index: 5, kind: input, shape index: {}]   ;;  %s1406_s6 = inlined_call_operand.hbm [shape: f32[2,16,128], index: 6, kind: output, shape index: {}]  }
   0x1   :  { %12 = vsyncpa [#allocation4], 0 }
   0x2   :  { %14 = vsyncpa [#allocation4 + $0x1], 0  ;;  %s1186_s21 = smov 0   ;;  %s1188_s22 = smov 0  }
   0x3   :  { %s1190_s23 = smov 0   ;;  %s1192_s24 = smov 0  }
   0x4   :  { %s1194_s25 = smov 0   ;;  %s1196_s26 = smov 0  }
   0x5 LB: > { %s803_s27 = sadd.s32 4294967295, %s1124_s26   ;;  %s804_s28 = sadd.s32 4294967294, %s1124_s26   ;;  %s1124_s26 = sphi %s1196_s26, %s20_s26   ;;  %s1120_s25 = sphi %s1194_s25, %s1425_s25   ;;  %s1116_s24 = sphi %s1192_s24, %s1424_s24   ;;  %s1112_s23 = sphi %s1190_s23, %s1423_s23   ;;  %s1108_s22 = sphi %s1188_s22, %s1422_s22   ;;  %s1104_s21 = sphi %s1186_s21, %s1421_s21  }
   0x6   : > { %s32_s29 = sadd.s32 1, %s1120_s25  ;;  %s184_s30 = sadd.s32 1, %s1112_s23 }
   0x7   : > { %p34_p0 = scmp.ge.s32.totalorder %s32_s29, 2  ;;  %p194_p1 = scmp.ne.s32.totalorder %s1112_s23, %s1108_s22 }
   0x8   : > { %p195_p2 = scmp.eq.s32.totalorder %s803_s27, 1  ;;  %p200_p3 = scmp.ne.s32.totalorder %s1108_s22, %s1104_s21 }
   0x9   : > { %s1427_s29 = smov (%p34_p0, %s32_s29), 0  ;;  %p201_p5 = scmp.eq.s32.totalorder %s804_s28, 1 }
   0xa   : > { %p1226_p4 = por %p195_p2, %p194_p1  ;;  %s179_s8 = ssub.s32 %s1120_s25, %s1427_s29 }
   0xb   : > { %p805_p6 = scmp.ge.s32.totalorder %s1124_s26, 1  ;;  %p182_p7 = scmp.eq.s32.totalorder %s179_s8, 0 }
   0xc   : > { %s1411_s7 = scalar_select %p1226_p4, 1, 0 }
   0xd   : > { %p1233_p8 = por %p201_p5, %p200_p3  ;;  %p208_p9 = scmp.lt.s32.totalorder %s1124_s26, 3 }
   0xe   : > { %s1239_s10 = scalar_select %p182_p7, %s1112_s23, %s184_s30  }
   0xf   : > { %s1412_s9 = scalar_select %p1233_p8, 1, 0 }
  0x10   : > { %p1241_p10 = pnand %p805_p6, %p208_p9  ;;  %p1245_p11 = scmp.eq.s32.totalorder %s803_s27, 0 }
  0x11   : > { %s1142_s13 = smov [#allocation2]   ;;  %s998_s18 = scalar_lea.hbm %s1404_s4, 1024 }
  0x12   : > { %s1413_s11 = scalar_select %p1241_p10, 1, 0 }
  0x13   : > { %s1414_s12 = scalar_select %p1245_p11, 1, 0 }
  0x14   : > { %p891_p12 = pneg %p1241_p10  ;;  %s223_s14 = sshll.u32 %s1142_s13, 4  ;;  %s224_s14 = int_to_ptr.vmem [resolvable:$true] %s223_s14 }
  0x15   : > { %p999_p0 = scmp.ne.s32.totalorder %s1404_s4, %s998_s18  ;;  %p1005_p5 = scmp.lt.u32.totalorder %s998_s18, %s1404_s4 }
  0x16   : > { %p1253_p13 = pnand %p1245_p11, %p891_p12 }
  0x18   : > { %p1000_p1 = pneg %p1253_p13 }
  0x1a   : > { %p1001_p2 = pnand %p1000_p1, %p999_p0 }
  0x1c   : > { %p1002_p3 = pneg %p1001_p2 }
  0x1e   : > { %p1007_p6 = pnand %p1005_p5, %p1002_p3 }
  0x20   : > { %1010 = shalt.err (!%p1007_p6)
}
  0x21   : > { %s1011_s30 = scalar_lea.vmem %s224_s14, 1024  ;;  %p1019_p8 = scmp.lt.s32.totalorder %s224_s14, %s224_s14 }
  0x22   : > { %p1012_p7 = scmp.ne.s32.totalorder %s224_s14, %s1011_s30  ;;  %p1020_p4 = scmp.lt.s32.totalorder %s1011_s30, %s1011_s30 }
  0x24   : > { %p1014_p9 = pnand %p1012_p7, %p1000_p1  ;;  %p1021_p11 = por %p1020_p4, %p1019_p8 }
  0x26   : > { %p1015_p12 = pneg %p1014_p9 }
  0x28   : > { %p1022_p10 = pnand %p1021_p11, %p1015_p12 }
  0x2a   : > { %1025 = shalt.err (!%p1022_p10)
}
  0x2b   : > { %s1143_s8 = smov 64   ;;  %s1144_s13 = smov 4  }
  0x2c   : > { %894 = dma.hbm_to_vmem [thread:$0]  (!%p1253_p13), %s1404_s4, 1024, %s224_s14, [#allocation3], %s1143_s8, %s1143_s8, %s1144_s13  }
  0x2d   : > { %p1416_p0 = scmp.ne.s32.totalorder %s1413_s11, 0 }
  0x2e   : > { %p1417_p2 = scmp.ne.s32.totalorder (!%p1416_p0), %s1414_s12, 0 }
  0x2f   : > { %270 = sbr.rel (%p1416_p0) target bundleno = 1180 (0x49c), region = 44 }
  0x36   : > { %1095 = dma.done.wait (%p1417_p2), [#allocation3], 1024  }
  0x37   : > { %1097 = vsyncadd (%p1417_p2), [#allocation3], 4294966272  ;;  %s310_s18 = sand.u32 1, %s1108_s22   ;;  %p314_p4 = scmp.lt.s32.totalorder %s1116_s24, 1  ;;  %vm339_vm0 = vcmask 64512   ;;  %v421_v5 = vlaneseq  ;;  %v1301_v9 = vmov 0  }
  0x38   : > { %s810_s15 = sshll.u32 %s310_s18, 4 }
  0x39   : > { %s315_s19 = scalar_select %p314_p4, %s1116_s24, 1  ;;  %v1297_v6 = vand.u32 127, %v421_v5 }
  0x3b   : > { %s813_s20 = sshll.u32 %s315_s19, 3  ;;  %s837_s14 = sshll.u32 %s315_s19, 4 }
  0x3c   : > { %s326_s28 = scalar_lea.vmem %s1401_s1, %s813_s20  ;;  %s331_s12 = scalar_lea.vmem %s1402_s2, %s813_s20 }
  0x3d   : > { %v336_v0 = vld [vmem:[%s326_s28] sm:$0xff]  ;;  %s321_s17 = scalar_lea.vmem %s1400_s0, %s837_s14  ;;  %s1299_s19 = scalar_lea.vmem [#allocation5], %s810_s15 }
  0x3e   : > { %v1290_v1 = vld [vmem:[%s331_s12] sm:$0xf]  ;;  %v1292_v2 = vld [vmem:[%s331_s12 + $0x4] sm:$0xf]  ;;  %854 = vmatprep.subr.mxu1 %v336_v0  ;;  %v335_v4 = vld [vmem:[%s321_s17 + $0x8] sm:$0xff]  ;;  %s1307_s20 = smov 0  }
  0x3f   : > { %v334_v3 = vld [vmem:[%s321_s17] sm:$0xff]  ;;  %855 = vmatpush3.msra.mxu1 %v336_v0 }
  0x40   : > { %856 = vmatprep.mubr.msk.f32.mxu1 %vm339_vm0, %v334_v3 }
  0x41   : > { %857 = vmatmul.mubr.msk.f32.vlgmr.msra.gmra.mrb[0].mxu1 %vm339_vm0, %v335_v4 }
 0x114   : > { %v858_v7 = vpop.f32.mrb[0].mxu1  }
 0x115   : > { %v412_v8 = vpop.f32.mrb[1].mxu1  }
 0x116 LB: >> { %vm432_vm1 = vcmask 130048   ;;  %v1145_v40 = vmov 0.0   ;;  %s428_s20 = sadd.s32 1, %s1140_s20   ;;  %s1140_s20 = sphi %s1307_s20, %s428_s20   ;;  %v1136_v8 = vphi %v412_v8, %v481_v8   ;;  %v1132_v7 = vphi %v858_v7, %v482_v7   ;;  %v1128_v9 = vphi %v1301_v9, %v1418_v9  }
 0x117   : >> { %v433_v10 = vsel %vm432_vm1, %v1136_v8, inf  ;;  %v436_v11 = vsel %vm432_vm1, %v1132_v7, inf  ;;  %p425_p8 = scmp.ge.s32.totalorder %s428_s20, 8  }
 0x118   : >> { %434 = vmin.xlane.f32.xlu0 %v433_v10  ;;  %v821_v45 = vcombine.low (%p425_p8), %v1290_v1, %v1292_v2  ;;  %v1146_v46 = vmov (%p425_p8), 0.0   ;;  %vm1147_vm8 = vmmov (%p425_p8), 0   ;;  %v990_v47 = vld [vmem:[#allocation2] sm:$0xff] (%p425_p8)   ;;  %v991_v48 = vld [vmem:[#allocation2 + $0x8] sm:$0xff] (%p425_p8)   ;;  %v992_v49 = vld [vmem:[#allocation2 + $0x10] sm:$0xff] (%p425_p8)   ;;  %s839_s28 = sshll.u32 (%p425_p8), %s1116_s24, 8 }
 0x119   : > { %859 = vmatprep.subr.bf16.mxu1 (%p425_p8), %v1146_v46  ;;  %861 = vmatprep.mubr.msk.bf16.mxu1 (%p425_p8), %vm1147_vm8, %v1146_v46  ;;  %v993_v50 = vld [vmem:[#allocation2 + $0x18] sm:$0xff] (%p425_p8)   ;;  %v994_v51 = vld [vmem:[#allocation2 + $0x20] sm:$0xff] (%p425_p8)   ;;  %v995_v52 = vld [vmem:[#allocation2 + $0x28] sm:$0xff] (%p425_p8)   ;;  %s674_s30 = sshll.u32 (%p425_p8), %s1299_s19, 4  ;;  %s1346_s13 = scalar_lea.hbm (%p425_p8), %s1406_s6, %s839_s28  ;;  %s1348_s30 = int_to_ptr.vmem [resolvable:$true] %s674_s30 }
 0x11a   : > { %860 = vmatpush3.bf16.msra.mxu1 (%p425_p8), %v821_v45  ;;  %865 = vmatprep.subr.bf16.mxu0 (%p425_p8), %v1146_v46  ;;  %v996_v53 = vld [vmem:[#allocation2 + $0x30] sm:$0xff] (%p425_p8)   ;;  %v997_v54 = vld [vmem:[#allocation2 + $0x38] sm:$0xff] (%p425_p8)   ;;  %v820_v55 = vld [vmem:[%s1403_s3] ss:$0 sm:$0xff] (%p425_p8)  ;;  %s1354_s24 = scalar_lea.sflag (%p425_p8), [#allocation4], %s310_s18  ;;  %s1026_s16 = scalar_lea.vmem (%p425_p8), %s1348_s30, 256 }
 0x11b   : > { %866 = vmatpush3.bf16.msra.mxu0 (%p425_p8), %v990_v47  ;;  %881 = vmatprep.mubr.msk.bf16.mxu0 (%p425_p8), %vm1147_vm8, %v1146_v46  ;;  %v823_v1 = vld [vmem:[%s1405_s5] ss:$0 sm:$0xff] (%p425_p8)  ;;  %p1027_p10 = scmp.ne.s32.totalorder (%p425_p8), %s1348_s30, %s1026_s16  ;;  %p1419_p11 = scmp.ne.s32.totalorder (%p425_p8), %s1411_s7, 0 }
 0x11c   : >> { %437 = vmin.xlane.f32.xlu0 %v436_v11  ;;  %867 = vmatprep.subr.bf16.mxu0 (%p425_p8), %v1146_v46  ;;  %s1148_s17 = smov (%p425_p8), [#allocation5]  }
 0x11d   : > { %p1028_p13 = pnand (%p425_p8), %p1027_p10, %p1419_p11  ;;  %s1030_s20 = sshll.u32 (%p425_p8), %s1148_s17, 4  ;;  %s1031_s20 = int_to_ptr.vmem [resolvable:$false] %s1030_s20 }
 0x11e   : > { %s1032_s15 = scalar_lea.vmem (%p425_p8), %s1031_s20, 512  ;;  %p1033_p3 = scmp.lt.s32.totalorder (%p425_p8), %s1348_s30, %s1031_s20 }
 0x11f   : > { %868 = vmatpush3.bf16.msra.mxu0 (%p425_p8), %v991_v48  ;;  %p1029_p1 = pneg (%p425_p8), %p1028_p13  ;;  %p1034_p5 = scmp.lt.s32.totalorder (%p425_p8), %s1032_s15, %s1026_s16 }
 0x120   : > { %869 = vmatprep.subr.bf16.mxu0 (%p425_p8), %v1146_v46 }
 0x121   : > { %p1035_p6 = por (%p425_p8), %p1034_p5, %p1033_p3 }
 0x123   : > { %870 = vmatpush3.bf16.msra.mxu0 (%p425_p8), %v992_v49  ;;  %p1036_p7 = pnand (%p425_p8), %p1035_p6, %p1029_p1 }
 0x124   : > { %871 = vmatprep.subr.bf16.mxu0 (%p425_p8), %v1146_v46 }
 0x127   : > { %872 = vmatpush3.bf16.msra.mxu0 (%p425_p8), %v993_v50 }
 0x128   : > { %873 = vmatprep.subr.bf16.mxu0 (%p425_p8), %v1146_v46 }
 0x12b   : > { %874 = vmatpush3.bf16.msra.mxu0 (%p425_p8), %v994_v51 }
 0x12c   : > { %875 = vmatprep.subr.bf16.mxu0 (%p425_p8), %v1146_v46 }
 0x12f   : > { %876 = vmatpush3.bf16.msra.mxu0 (%p425_p8), %v995_v52 }
 0x130   : > { %877 = vmatprep.subr.bf16.mxu0 (%p425_p8), %v1146_v46 }
 0x133   : > { %878 = vmatpush3.bf16.msra.mxu0 (%p425_p8), %v996_v53 }
 0x134   : > { %879 = vmatprep.subr.bf16.mxu0 (%p425_p8), %v1146_v46 }
 0x137   : > { %880 = vmatpush3.bf16.msra.mxu0 (%p425_p8), %v997_v54 }
 0x1a5   : >> { %v435_v12 = vpop.xlane.xlu0 %434 }
 0x1a6   : >> { %vm439_vm2 = vcmp.eq.f32.partialorder %v1136_v8, %v435_v12 }
 0x1a7   : >> { %v441_v13 = vsel %vm439_vm2, %v1297_v6, 16 }
 0x1a8   : >> { %v443_v14 = vsel %vm432_vm1, %v441_v13, 2147483647 }
 0x1a9   : >> { %v438_v15 = vpop.xlane.xlu0 %437  ;;  %v445_v16 = vshra.s32 %v443_v14, 16  ;;  %v444_v22 = vand.u32 65535, %v443_v14 }
 0x1aa   : >> { %vm440_vm3 = vcmp.eq.f32.partialorder %v1132_v7, %v438_v15 }
 0x1ab   : >> { %v442_v17 = vsel %vm440_vm3, %v1297_v6, 16  ;;  %v447_v18 = vcvt.s32.f32 %v445_v16  ;;  %v446_v25 = vcvt.s32.f32 %v444_v22 }
 0x1ac   : >> { %v458_v19 = vsel %vm432_vm1, %v442_v17, 2147483647 }
 0x1ad   : >> { %448 = vmin.xlane.f32.xlu1 %v447_v18  ;;  %v460_v20 = vshra.s32 %v458_v19, 16  ;;  %v459_v23 = vand.u32 65535, %v458_v19 }
 0x1af   : >> { %v462_v21 = vcvt.s32.f32 %v460_v20  ;;  %v461_v28 = vcvt.s32.f32 %v459_v23 }
 0x1b1   : >> { %463 = vmin.xlane.f32.xlu1 %v462_v21 }
 0x23a   : >> { %v449_v24 = vpop.xlane.xlu1 %448 }
 0x23b   : >> { %vm450_vm4 = vcmp.eq.f32.partialorder %v447_v18, %v449_v24  ;;  %v455_v30 = vcvt.f32.s32 %v449_v24 }
 0x23c   : >> { %v451_v26 = vsel %vm450_vm4, %v446_v25, inf }
 0x23d   : >> { %452 = vmin.xlane.f32.xlu0 %v451_v26  ;;  %v456_v32 = vshll.u32 %v455_v30, 16 }
 0x23e   : >> { %v464_v27 = vpop.xlane.xlu1 %463 }
 0x23f   : >> { %vm465_vm5 = vcmp.eq.f32.partialorder %v462_v21, %v464_v27  ;;  %v470_v33 = vcvt.f32.s32 %v464_v27 }
 0x240   : >> { %v466_v29 = vsel %vm465_vm5, %v461_v28, inf }
 0x241   : >> { %467 = vmin.xlane.f32.xlu1 %v466_v29  ;;  %v471_v37 = vshll.u32 %v470_v33, 16 }
 0x2ca   : >> { %v453_v31 = vpop.xlane.xlu0 %452 }
 0x2cb   : >> { %v454_v34 = vcvt.f32.s32 %v453_v31 }
 0x2cd   : >> { %v457_v35 = vadd.s32 %v456_v32, %v454_v34 }
 0x2ce   : >> { %v468_v36 = vpop.xlane.xlu1 %467 }
 0x2cf   : >> { %vm473_vm6 = vcmp.eq.s32.totalorder %v1297_v6, %v457_v35  ;;  %v469_v38 = vcvt.f32.s32 %v468_v36 }
 0x2d0   : >> { %v481_v8 = vsel %vm473_vm6, 1e+30, %v1136_v8   ;;  %v818_v41 = vsel %vm473_vm6, 1.0, %v1145_v40 }
 0x2d1   : >> { %v472_v39 = vadd.s32 %v471_v37, %v469_v38 }
 0x2d3   : >> { %vm474_vm7 = vcmp.eq.s32.totalorder %v1297_v6, %v472_v39  ;;  %427 = sbr.rel (!%p425_p8) target bundleno = 278 (0x116), region = 97 }
 0x2d4   : >> { %v819_v42 = vsel %vm474_vm7, 1.0, %v1145_v40  ;;  %v482_v7 = vsel %vm474_vm7, 1e+30, %v1132_v7  }
 0x2d5   : >> { %v479_v43 = vpack.c.bf16 %v819_v42, %v818_v41 }
 0x2d7   : >> { %v480_v44 = vadd.bf16 %v1128_v9, %v479_v43  }
 0x2d9   : >> { %v1418_v9 = vmov %v480_v44  ;;  %862 = vmatmul.mubr.msk.bf16.vlgmr.msra.gmra.mrb[4].mxu1 (%p425_p8), %vm432_vm1, %v480_v44 }
 0x3ac   : > { %v534_v56 = vpop.f32.mrb[4].mxu1 }
 0x3ad   : > { %v535_v57 = vadd.f32 %v820_v55, %v534_v56  ;;  %v863_v58 = vpop.f32.mrb[5].mxu1 }
 0x3ae   : > { %v537_v59 = vpop.f32.mrb[6].mxu1 }
 0x3af   : > { %v538_v60 = vadd.f32 %v820_v55, %v537_v59  ;;  %v864_v61 = vpop.f32.mrb[7].mxu1  ;;  %v541_v62 = vmax.f32 %v535_v57, 0.0 }
 0x3b1   : > { %v542_v63 = vmax.f32 %v538_v60, 0.0 }
 0x3b3   : > { %v543_v0 = vpack.c.bf16 %v542_v63, %v541_v62 }
 0x3b5   : > { %882 = vmatmul.mubr.bf16.vlgmr.msra.gmra.mrb[0].mxu0 %v543_v0 }
 0x488   : > { %v649_v2 = vpop.f32.mrb[0].mxu0 }
 0x489   : > { %v650_v3 = vadd.f32 %v823_v1, %v649_v2  ;;  %v883_v4 = vpop.f32.mrb[1].mxu0 }
 0x48a   : > { %v652_v5 = vpop.f32.mrb[2].mxu0 }
 0x48b   : > { %656 = vst [vmem:[%s1299_s19] sm:$0xff] %v650_v3  ;;  %v653_v6 = vadd.f32 %v823_v1, %v652_v5  ;;  %v884_v7 = vpop.f32.mrb[3].mxu0 }
 0x48d   : > { %657 = vst [vmem:[%s1299_s19 + $0x8] sm:$0xff] %v653_v6 }
 0x48e   : > { %1039 = shalt.err (!%p1036_p7)
}
 0x48f   : > { %s1040_s18 = scalar_lea.hbm %s1346_s13, 256  ;;  %s1044_s27 = scalar_lea.hbm %s1406_s6, 512 }
 0x490   : > { %p1041_p9 = scmp.ne.s32.totalorder %s1346_s13, %s1040_s18  ;;  %p1045_p2 = scmp.lt.u32.totalorder %s1346_s13, %s1406_s6 }
 0x491   : > { %p1046_p4 = scmp.lt.u32.totalorder %s1044_s27, %s1040_s18  ;;  %p1048_p10 = scmp.lt.u32.totalorder %s1040_s18, %s1346_s13 }
 0x492   : > { %p1042_p12 = pnand %p1041_p9, %p1419_p11 }
 0x493   : > { %p1047_p8 = por %p1046_p4, %p1045_p2 }
 0x494   : > { %p1043_p0 = pneg %p1042_p12 }
 0x495   : > { %p1049_p13 = por %p1048_p10, %p1047_p8 }
 0x497   : > { %p1050_p1 = pnand %p1049_p13, %p1043_p0 }
 0x499   : > { %1053 = shalt.err (!%p1050_p1)
}
 0x49a   : > { %s1149_s8 = smov 128   ;;  %s1150_s12 = smov 8  }
 0x49b   : > { %889 = dma.vmem_to_hbm [thread:$0]  (%p1419_p11), %s1348_s30, 256, %s1346_s13, %s1354_s24, %s1149_s8, %s1149_s8, %s1150_s12  }
 0x49c PF: > { %p901_p3 = scmp.ge.s32.totalorder %s1124_s26, 2  ;;  %s689_s16 = sand.u32 1, %s1104_s21  }
 0x49d   : > { %p1420_p5 = scmp.ne.s32.totalorder %s1412_s9, 0  ;;  %s690_s17 = scalar_lea.sflag [#allocation4], %s689_s16 }
 0x49f   : > { %p896_p6 = pnand %p901_p3, %p1420_p5 }
 0x4a1   : > { %1099 = dma.done.wait (!%p896_p6), %s690_s17, 256  }
 0x4a2   : > { %1101 = vsyncadd (!%p896_p6), %s690_s17, 4294967040  ;;  %s20_s26 = sadd.s32 1, %s1124_s26   ;;  %s1421_s21 = smov %s1108_s22 }
 0x4a3   : > { %p17_p7 = scmp.ge.s32.totalorder %s20_s26, 4   ;;  %s1422_s22 = smov %s1112_s23 }
 0x4a4   : > { %s1423_s23 = smov %s1239_s10  ;;  %s1424_s24 = smov %s1120_s25 }
 0x4a5   : > { %s1425_s25 = smov %s1427_s29  ;;  %19 = sbr.rel (!%p17_p7) target bundleno = 5 (0x5), region = 108 }
 0x4ac   :  { %695 = vsyncpa [#allocation3], 1 }
 0x4ad   :  { %697 = vsyncpa [#allocation3 + $0x1], 1 }
 0x4ae   :  { %698 = vsyncpa [#allocation4], 1 }
 0x4af   :  { %700 = vsyncpa [#allocation4 + $0x1], 1 }

</bundles_post_ra>
